<compile_context>
chip_gen: v7x
topology: tpu7x:2x2x1
jax: 0.10.0
libtpu: 0.0.40
codegen_flags: <defaults>
</compile_context>

<pallas_src>
import math

import jax
import jax.numpy as jnp
from jax.experimental import pallas as pl
from jax.experimental.pallas import tpu as pltpu


def make_positional_encoding(d_model: int, max_len: int, dtype=jnp.float32):
    """Builds the (max_len, d_model) sinusoidal table exactly like the module."""
    position = jnp.arange(max_len, dtype=jnp.float32)[:, None]           # (L, 1)
    div_term = jnp.exp(
        jnp.arange(0, d_model, 2, dtype=jnp.float32)
        * -(math.log(10000.0) / d_model)
    )                                                                     # (D/2,)
    angles = position * div_term                                          # (L, D/2)
    pe = jnp.zeros((max_len, d_model), dtype=jnp.float32)
    pe = pe.at[:, 0::2].set(jnp.sin(angles))
    pe = pe.at[:, 1::2].set(jnp.cos(angles))
    return pe.astype(dtype)


def _add_kernel_2d(x_ref, pe_ref, o_ref):
    # Batch dim squeezed away: pure (tR, C) vld / vadd / vst.
    o_ref[...] = x_ref[...] + pe_ref[...]


def _add_kernel_whole(x_ref, pe_ref, o_ref):
    # Single-step path for tiny problems: (B, R, C) + (R, C) broadcast add.
    o_ref[...] = x_ref[...] + pe_ref[...]


def _auto_tuning():
    """(tile_target_bytes, vmem_limit_bytes) per TPU generation."""
    try:
        kind = jax.devices()[0].device_kind.lower()
    except Exception:
        kind = ""
    if "v5" in kind:
        return 2 * 1024 * 1024, 32 * 1024 * 1024   # v5e: scoped default is 16 MiB
    if "v6" in kind:
        return 4 * 1024 * 1024, 48 * 1024 * 1024   # 128 MiB physical VMEM
    if "v7" in kind:
        return 4 * 1024 * 1024, 40 * 1024 * 1024   # 64 MiB physical VMEM -> headroom
    return 2 * 1024 * 1024, 32 * 1024 * 1024       # conservative default


def _pick_lane_width(flat: int, cap: int = 4096):
    """Largest multiple of 128 dividing `flat` and <= cap (else None)."""
    if flat % 128 != 0:
        return None
    best = None
    c = 128
    while c <= min(flat, cap):
        if flat % c == 0:
            best = c
        c += 128
    return best


def _pick_tile_rows(rows: int, cols: int, itemsize: int, target_bytes: int) -> int:
    """Rows per block: full `rows` if it fits under target, else a multiple of
    8 sized to ~target_bytes.  Non-divisible cases are handled by cdiv + a
    ragged (padded/masked) last block."""
    if rows * cols * itemsize <= target_bytes or rows <= 8:
        return rows
    t = (target_bytes // (cols * itemsize)) // 8 * 8
    t = max(8, t)
    return min(t, rows)


def positional_encoding_forward(x, pe_full, *, donate_x: bool = False,
                                target_bytes=None, small_bytes: int = 512 * 1024,
                                vmem_limit_bytes=None):
    """x: [B, S, D]; pe_full: [max_len, D].  Returns x + pe[:S] (dropout=eval)."""
    B, S, D = x.shape
    max_len, Dp = pe_full.shape
    assert Dp == D and max_len >= S
    itemsize = jnp.dtype(x.dtype).itemsize

    auto_tile, auto_vmem = _auto_tuning()
    if target_bytes is None:
        target_bytes = auto_tile
    if vmem_limit_bytes is None:
        vmem_limit_bytes = auto_vmem

    # Slice BEFORE casting: never touch (or cast) more than S rows of the table.
    pe_s = pe_full[:S].astype(x.dtype)

    # --- choose a lane-dense 2D layout (R, C) of the per-batch (S, D) slab ---
    if D % 128 == 0:
        mode = "native"
        R, C = S, D
        x2, pe2 = x, pe_s
    else:
        C = _pick_lane_width(S * D)
        if C is not None:
            # Flatten (S, D) -> (R, C) with C % 128 == 0: unmasked lane-dense vst.
            mode = "flat"
            R = (S * D) // C
            x2 = x.reshape(B, R, C)          # contiguous collapse: free
            pe2 = pe_s.reshape(R, C)
        else:
            # Pad feature dim to the next multiple of 128 instead of running a
            # lane-sparse layout (masked vst.msk is the big store-path penalty).
            mode = "pad"
            Cp = ((D + 127) // 128) * 128
            R, C = S, Cp
            x2 = jnp.pad(x, ((0, 0), (0, 0), (0, Cp - D)))
            pe2 = jnp.pad(pe_s, ((0, 0), (0, Cp - D)))

    io_alias = {0: 0} if donate_x else {}
    total_bytes = B * R * C * itemsize

    if total_bytes <= small_bytes:
        # Tiny problem: one-step grid, whole slab resident in VMEM.  Avoids
        # paying the ~0.35 us per-grid-step overhead many times for <1 MiB.
        out2 = pl.pallas_call(
            _add_kernel_whole,
            out_shape=jax.ShapeDtypeStruct((B, R, C), x.dtype),
            input_output_aliases=io_alias,
        )(x2, pe2)
    else:
        tR = _pick_tile_rows(R, C, itemsize, target_bytes)
        nR = pl.cdiv(R, tR)                  # ragged last block handled by Pallas
        # Batch innermost: pe's block index is constant across consecutive
        # steps, so the shared pe tile stays resident (no re-DMA per batch).
        grid = (nR, B)
        out2 = pl.pallas_call(
            _add_kernel_2d,
            out_shape=jax.ShapeDtypeStruct((B, R, C), x.dtype),
            grid_spec=pltpu.PrefetchScalarGridSpec(
                num_scalar_prefetch=0,
                grid=grid,
                in_specs=[
                    pl.BlockSpec((pl.Squeezed(), tR, C), lambda r, b: (b, r, 0)),
                    pl.BlockSpec((tR, C), lambda r, b: (r, 0)),
                ],
                out_specs=pl.BlockSpec((pl.Squeezed(), tR, C), lambda r, b: (b, r, 0)),
            ),
            compiler_params=pltpu.CompilerParams(
                # Row axis megacore-shardable (v7x); batch kept "arbitrary" so
                # each core streams disjoint rows with its own resident pe tile.
                dimension_semantics=("parallel", "arbitrary"),
                vmem_limit_bytes=vmem_limit_bytes,
            ),
            input_output_aliases=io_alias,
        )(x2, pe2)

    if mode == "flat":
        return out2.reshape(B, S, D)
    if mode == "pad":
        return out2[:, :, :D]
    return out2


if __name__ == "__main__":
    key = jax.random.PRNGKey(0)
    k1, k2, k3 = jax.random.split(key, 3)

    # Case 1: the module's small demo shape (batch=2, seq=8, d_model=32).
    # S*D = 256 is a multiple of 128 -> lane-dense flattened layout, tiny
    # problem -> single-step whole-slab path.
    B, S, D = 2, 8, 32
    max_len = 64  # module default is 5000; only the first S rows are used
    x = jax.random.normal(k1, (B, S, D), dtype=jnp.float32)
    pe_full = make_positional_encoding(D, max_len)
    out = jax.block_until_ready(positional_encoding_forward(x, pe_full))
    ref = x + pe_full[None, :S, :]
    assert jnp.allclose(out, ref, atol=1e-6), "mismatch vs reference (case 1)"

    # Case 2: exercises the tiled (grid) path with a lane-dense feature dim.
    B2, S2, D2 = 2, 512, 256
    x2 = jax.random.normal(k2, (B2, S2, D2), dtype=jnp.float32)
    pe2_full = make_positional_encoding(D2, 1024)
    out2 = jax.block_until_ready(
        positional_encoding_forward(x2, pe2_full, small_bytes=0))
    ref2 = x2 + pe2_full[None, :S2, :]
    assert jnp.allclose(out2, ref2, atol=1e-6), "mismatch vs reference (case 2)"

    # Case 3: exercises ragged cdiv row tiling (last row-block partially full).
    B3, S3, D3 = 1, 72, 128
    x3 = jax.random.normal(k3, (B3, S3, D3), dtype=jnp.float32)
    pe3_full = make_positional_encoding(D3, 128)
    out3 = jax.block_until_ready(
        positional_encoding_forward(x3, pe3_full, small_bytes=0,
                                    target_bytes=16 * 1024))
    ref3 = x3 + pe3_full[None, :S3, :]
    assert jnp.allclose(out3, ref3, atol=1e-6), "mismatch vs reference (case 3)"

    print("KERNEL_OK")
</pallas_src>

<mosaic_0001>
module attributes {stable_mosaic.version = 11 : i64} {
  func.func @_add_kernel_whole(%arg0: memref<2x1x256xf32, #tpu.memory_space<vmem>>, %arg1: memref<1x256xf32, #tpu.memory_space<vmem>>, %arg2: memref<2x1x256xf32, #tpu.memory_space<vmem>>) attributes {dimension_semantics = [], scalar_prefetch = 0 : i64, scratch_operands = 0 : i64, tpu.core_type = #tpu.core_type<tc>} {
    %c0 = arith.constant 0 : index
    %c0_0 = arith.constant 0 : index
    %c0_1 = arith.constant 0 : index
    %0 = vector.load %arg0[%c0, %c0_0, %c0_1] : memref<2x1x256xf32, #tpu.memory_space<vmem>>, vector<2x1x256xf32>
    %c0_2 = arith.constant 0 : index
    %c0_3 = arith.constant 0 : index
    %1 = vector.load %arg1[%c0_2, %c0_3] : memref<1x256xf32, #tpu.memory_space<vmem>>, vector<1x256xf32>
    %2 = vector.shape_cast %1 : vector<1x256xf32> to vector<1x1x256xf32>
    %3 = vector.broadcast %2 : vector<1x1x256xf32> to vector<2x1x256xf32>
    %4 = arith.addf %0, %3 : vector<2x1x256xf32>
    %c0_4 = arith.constant 0 : index
    %c0_5 = arith.constant 0 : index
    %c0_6 = arith.constant 0 : index
    %5 = vector.load %arg2[%c0_4, %c0_5, %c0_6] : memref<2x1x256xf32, #tpu.memory_space<vmem>>, vector<2x1x256xf32>
    tpu.vector_store %arg2[%c0_4, %c0_5, %c0_6], %4 {strides = array<i32>} : memref<2x1x256xf32, #tpu.memory_space<vmem>>, vector<2x1x256xf32>,
    return
  }
}

</mosaic_0001>

<bundles_post_ra>
// kernel: tpu_custom_call.1
= control target key start
LH: loop header
LB: loop body
LE: loop exit
PB: predicated region body
PF: predicated region fallthrough
CT: control target
= control target key end

     0   :  { %7 = vsyncpa [#allocation3], 0  ;;  %s158_s0 = inlined_call_operand.hbm [shape: f32[2,1,256], index: 0, kind: input, shape index: {}]   ;;  %s159_s1 = inlined_call_operand.vmem [shape: f32[1,256], index: 1, kind: input, shape index: {}]   ;;  %s160_s2 = inlined_call_operand.hbm [shape: f32[2,1,256], index: 2, kind: output, shape index: {}]  }
   0x1   :  { %8 = vsyncpa [#allocation4], 0  ;;  %s106_s9 = smov [#allocation2]   ;;  %s58_s13 = scalar_lea.hbm %s158_s0, 64 }
   0x2   :  { %s14_s10 = sshll.u32 %s106_s9, 4  ;;  %p59_p0 = scmp.ne.s32.totalorder %s158_s0, %s58_s13  ;;  %s15_s10 = int_to_ptr.vmem [resolvable:$true] %s14_s10 }
   0x3   :  { %p62_p1 = scmp.lt.u32.totalorder %s58_s13, %s158_s0 }
   0x5   :  { %p64_p2 = pnand %p62_p1, %p59_p0 }
   0x7   :  { %67 = shalt.err (!%p64_p2)
}
   0x8   :  { %s68_s18 = scalar_lea.vmem %s15_s10, 64  ;;  %p73_p4 = scmp.lt.s32.totalorder %s15_s10, %s15_s10 }
   0x9   :  { %p69_p3 = scmp.ne.s32.totalorder %s15_s10, %s68_s18  ;;  %p74_p5 = scmp.lt.s32.totalorder %s68_s18, %s68_s18 }
   0xb   :  { %p75_p6 = por %p74_p5, %p73_p4 }
   0xd   :  { %p76_p7 = pnand %p75_p6, %p69_p3 }
   0xf   :  { %79 = shalt.err (!%p76_p7)
}
  0x10   :  { %s107_s19 = smov 32   ;;  %s108_s20 = smov 2  }
  0x11   :  { %20 = dma.hbm_to_vmem [thread:$0]  %s158_s0, 64, %s15_s10, [#allocation3], %s107_s19, %s107_s19, %s108_s20  }
  0x12   :  { %102 = dma.done.wait [#allocation3], 64  }
  0x13   :  { %103 = vsyncadd [#allocation3], 4294967232  ;;  %v31_v0 = vlaneseq  ;;  %s109_s23 = smov [#allocation5]   ;;  %v26_v1 = vld [vmem:[#allocation2] sm:$0x3] }
  0x14   :  { %s42_s24 = sshll.u32 %s109_s23, 4  ;;  %v28_v2 = vld [vmem:[%s159_s1] sm:$0x3]  ;;  %v27_v3 = vld [vmem:[#allocation2 + $0x2] sm:$0x3]  ;;  %s43_s24 = int_to_ptr.vmem [resolvable:$true] %s42_s24 }
  0x15   :  { %vm33_vm0 = vcmp.lt.s32.totalorder %v31_v0, 256  ;;  %v29_v4 = vadd.f32 %v28_v2, %v26_v1  ;;  %v30_v5 = vadd.f32 %v28_v2, %v27_v3  ;;  %s80_s27 = scalar_lea.vmem %s43_s24, 64  ;;  %p85_p9 = scmp.lt.s32.totalorder %s43_s24, %s43_s24 }
  0x16   :  { %p81_p8 = scmp.ne.s32.totalorder %s43_s24, %s80_s27  ;;  %p86_p10 = scmp.lt.s32.totalorder %s80_s27, %s80_s27 }
  0x17   :  { %35 = vst.msk [vmem:[#allocation5] sm:$0x3] %vm33_vm0, %v29_v4  ;;  %36 = vst.msk [vmem:[#allocation5 + $0x2] sm:$0x3] %vm33_vm0, %v30_v5 }
  0x18   :  { %p87_p11 = por %p86_p10, %p85_p9 }
  0x1a   :  { %p88_p12 = pnand %p87_p11, %p81_p8 }
  0x1c   :  { %91 = shalt.err (!%p88_p12)
}
  0x1d   :  { %s92_s29 = scalar_lea.hbm %s160_s2, 64 }
  0x1e   :  { %p93_p13 = scmp.ne.s32.totalorder %s160_s2, %s92_s29  ;;  %p96_p0 = scmp.lt.u32.totalorder %s92_s29, %s160_s2 }
  0x20   :  { %p98_p1 = pnand %p96_p0, %p93_p13 }
  0x22   :  { %101 = shalt.err (!%p98_p1)
}
  0x23   :  { %48 = dma.vmem_to_hbm [thread:$0]  %s43_s24, 64, %s160_s2, [#allocation4], %s107_s19, %s107_s19, %s108_s20  }
  0x24   :  { %104 = dma.done.wait [#allocation4], 64  }
  0x25   :  { %105 = vsyncadd [#allocation4], 4294967232 }
  0x26   :  { %52 = vsyncpa [#allocation3], 1 }
  0x27   :  { %53 = vsyncpa [#allocation4], 1 }

</bundles_post_ra>
